<compile_context>
chip_gen: v5e
topology: v5e:2x2
jax: 0.10.0
libtpu: 0.0.40
codegen_flags: <defaults>
</compile_context>

<pallas_src>
import numpy as np

import jax
import jax.numpy as jnp
from jax.experimental import pallas as pl
from jax.experimental.pallas import tpu as pltpu

# ----------------------------- config ---------------------------------------
CFG = [8, "M", 16, "M", 32, "M"]   # int = conv3x3(pad=1)+ReLU out-channels, 'M' = maxpool2x2
IN_CH = 3
SPATIAL = 16
HIDDEN = 64                        # stand-in for 4096
NUM_CLASSES = 10                   # stand-in for 1000


def _conv_stages():
    stages = []
    c, s = IN_CH, SPATIAL
    for v in CFG:
        if v == "M":
            continue
        stages.append((c, v, s))     # (Cin, Cout, input spatial)
        c, s = v, s // 2
    return stages, c, s              # stages, C_last, S_last


# ------------------------------ fused kernel ---------------------------------
def _build_kernel(batch):
    stages, _, _ = _conv_stages()

    def conv_pool_block(src_ref, w_ref, b_ref, s_in, cout):
        # src_ref: (batch*Hp, Wp*Cin) zero-padded activation (f32, VMEM)
        # w_ref  : (3*Wp*Cin, 2*w2*Cout) bf16 structured conv weight
        #          (kw offsets + pool-dj taps + pooled-w decimation folded in at init)
        # b_ref  : (1, w2*Cout) f32 conv bias tiled over pooled w positions
        hp = s_in + 2
        h2 = s_in // 2
        wcols = h2 * cout
        t = (batch - 1) * (hp // 2) + h2          # rows per tap slice (incl. inter-image gap rows)
        # stride-2 sublane reads: offset s = di + kh selects all pooled-tap rows of every image
        taps = [src_ref[pl.ds(s, t, stride=2), :] for s in range(4)]
        lhs = jnp.concatenate(
            [jnp.concatenate(taps[0:3], axis=1),   # pool tap di = 0 -> kh = 0,1,2
             jnp.concatenate(taps[1:4], axis=1)],  # pool tap di = 1 -> kh = 0,1,2
            axis=0).astype(jnp.bfloat16)           # (2t, 3*Wp*Cin)
        raw = jnp.dot(lhs, w_ref[...], preferred_element_type=jnp.float32)  # (2t, 2*wcols)
        m = jnp.maximum(raw[:t, :], raw[t:, :])        # max over pool tap di (rows)
        m = jnp.maximum(m[:, :wcols], m[:, wcols:])    # max over pool tap dj (lane halves)
        # maxpool(relu(conv + b)) == relu(max_taps(conv) + b)
        return jnp.maximum(m + b_ref[...], 0.0)        # (t, wcols) f32; image n rows at n*(hp//2)+ii

    def store_padded(dst_ref, pooled, s_in, cout):
        # scatter the pooled block output into the next block's zero-padded 2D activation
        h2 = s_in // 2
        src_half = (s_in + 2) // 2
        hp_dst = h2 + 2
        dst_ref[...] = jnp.zeros_like(dst_ref)
        for n in range(batch):
            dst_ref[n * hp_dst + 1: n * hp_dst + 1 + h2,
                    cout: cout + h2 * cout] = pooled[n * src_half: n * src_half + h2, :]

    (_, o1, s1), (_, o2, s2), (_, o3, s3) = stages

    def kernel(x_ref,
               cw1, cb1, cw2, cb2, cw3, cb3,
               fw0, fb0, fw1, fb1, fw2, fb2,
               o_ref, act2_ref, act3_ref):
        # ---- features: three fused conv3x3 + ReLU + maxpool2x2 blocks (all in VMEM) ----
        p1 = conv_pool_block(x_ref, cw1, cb1, s1, o1)
        store_padded(act2_ref, p1, s1, o1)
        p2 = conv_pool_block(act2_ref, cw2, cb2, s2, o2)
        store_padded(act3_ref, p2, s2, o2)
        p3 = conv_pool_block(act3_ref, cw3, cb3, s3, o3)   # valid rows at n*((s3+2)//2)+ii

        # ---- classifier: Linear+ReLU+Dropout, Linear+ReLU+Dropout, Linear ----
        hp3_half = (s3 + 2) // 2
        wcols3 = (s3 // 2) * o3
        h = fb0[...]
        for ii in range(s3 // 2):   # FC0 consumes pooled rows directly; flatten folded into fw0
            rows = jnp.concatenate(
                [p3[n * hp3_half + ii: n * hp3_half + ii + 1, :] for n in range(batch)],
                axis=0).astype(jnp.bfloat16)                 # (batch, wcols3)
            h = h + jnp.dot(rows, fw0[ii * wcols3:(ii + 1) * wcols3, :],
                            preferred_element_type=jnp.float32)
        h = jnp.maximum(h, 0.0)
        # TODO(synk): nn.Dropout is identity here (eval-mode inference); stochastic training dropout not implemented.
        h = jnp.dot(h.astype(jnp.bfloat16), fw1[...],
                    preferred_element_type=jnp.float32) + fb1[...]
        h = jnp.maximum(h, 0.0)
        o_ref[...] = jnp.dot(h.astype(jnp.bfloat16), fw2[...],
                             preferred_element_type=jnp.float32) + fb2[...]

    return kernel, stages


# ------------------------------- forward -------------------------------------
def vgg_forward(x_nchw, params):
    n, cin, s, _ = x_nchw.shape
    kernel, stages = _build_kernel(n)
    (_, _, s1), (c2, _, s2), (c3, _, s3) = stages
    assert cin == IN_CH and s == SPATIAL and s == s1

    # Only wrapper-side prep: NCHW -> NHWC, zero-pad(1), fold into padded 2D layout (~4 KB).
    x = jnp.transpose(x_nchw, (0, 2, 3, 1))
    x = jnp.pad(x, ((0, 0), (1, 1), (1, 1), (0, 0)))
    x2d = x.reshape(n * (s + 2), (s + 2) * cin).astype(jnp.float32)

    def full(arr):
        return pl.BlockSpec(arr.shape, lambda i: (0, 0))

    inputs = (x2d,) + tuple(params)
    return pl.pallas_call(
        kernel,
        out_shape=jax.ShapeDtypeStruct((n, NUM_CLASSES), jnp.float32),
        grid=(1,),
        in_specs=[full(a) for a in inputs],
        out_specs=pl.BlockSpec((n, NUM_CLASSES), lambda i: (0, 0)),
        scratch_shapes=[
            pltpu.VMEM((n * (s2 + 2), (s2 + 2) * c2), jnp.float32),  # block-2 padded input
            pltpu.VMEM((n * (s3 + 2), (s3 + 2) * c3), jnp.float32),  # block-3 padded input
        ],
        compiler_params=pltpu.CompilerParams(dimension_semantics=("arbitrary",)),
    )(*inputs)


# ---------------------------- parameter init ---------------------------------
def init_params(key):
    stages, c_last, s_last = _conv_stages()
    params = []

    # Conv blocks: kaiming_normal_(fan_out, relu) weights, zero bias.  Fold the 3 kw
    # offsets, the 2 pool-dj taps and the pooled-w decimation into a block-banded
    # "structured" weight of shape (3*Wp*Cin, 2*w2*Cout).
    for (cin, cout, sp) in stages:
        key, k1 = jax.random.split(key)
        std = (2.0 / (cout * 9)) ** 0.5
        w = std * jax.random.normal(k1, (cout, cin, 3, 3), jnp.float32)   # PyTorch (Cout,Cin,kh,kw)
        wt = np.asarray(w).transpose(2, 3, 1, 0)                          # (kh, kw, cin, cout)
        wp = sp + 2
        w2 = sp // 2
        wcat = np.zeros((3 * wp * cin, 2 * w2 * cout), np.float32)
        for kh in range(3):
            for dj in range(2):
                for jj in range(w2):
                    for kw in range(3):
                        q = 2 * jj + dj + kw                 # padded input w-position, in [0, Wp)
                        r0 = kh * wp * cin + q * cin
                        c0 = dj * w2 * cout + jj * cout
                        wcat[r0:r0 + cin, c0:c0 + cout] = wt[kh, kw]
        params.append(jnp.asarray(wcat, jnp.bfloat16))
        params.append(jnp.zeros((1, w2 * cout), jnp.float32))   # conv bias = 0, tiled over pooled w

    # Classifier: normal_(0, 0.01) weights, zero bias.  Absorb the NCHW x.view(N,-1)
    # flatten into fw0 by permuting its rows to the kernel's (ii, jj, c) row order.
    flat = c_last * s_last * s_last
    perm = np.zeros(flat, np.int32)
    k = 0
    for ii in range(s_last):
        for jj in range(s_last):
            for ch in range(c_last):
                perm[k] = ch * s_last * s_last + ii * s_last + jj
                k += 1
    for li, (fin, fout) in enumerate([(flat, HIDDEN), (HIDDEN, HIDDEN), (HIDDEN, NUM_CLASSES)]):
        key, k1 = jax.random.split(key)
        w = 0.01 * jax.random.normal(k1, (fout, fin), jnp.float32)
        wt = np.asarray(w).T                                   # (fin, fout)
        if li == 0:
            wt = wt[perm, :]
        params.append(jnp.asarray(wt, jnp.bfloat16))
        params.append(jnp.zeros((1, fout), jnp.float32))
    return tuple(params)


# activations=True / gradient-hook capture is PyTorch autograd bookkeeping (no Pallas
# equivalent); the default activations=False forward path is implemented above.
if __name__ == "__main__":
    key = jax.random.PRNGKey(0)
    k_x, k_p = jax.random.split(key)
    x = jax.random.normal(k_x, (2, IN_CH, SPATIAL, SPATIAL), jnp.float32)  # NCHW like PyTorch
    params = init_params(k_p)

    out = jax.block_until_ready(jax.jit(vgg_forward)(x, params))
    assert out.shape == (2, NUM_CLASSES), out.shape
    assert bool(jnp.all(jnp.isfinite(out)))
    print("KERNEL_OK")
</pallas_src>

<mosaic_0001>
module attributes {stable_mosaic.version = 11 : i64} {
  func.func @kernel(%arg0: i32, %arg1: memref<36x54xf32, #tpu.memory_space<vmem>>, %arg2: memref<162x128xbf16, #tpu.memory_space<vmem>>, %arg3: memref<1x64xf32, #tpu.memory_space<vmem>>, %arg4: memref<240x128xbf16, #tpu.memory_space<vmem>>, %arg5: memref<1x64xf32, #tpu.memory_space<vmem>>, %arg6: memref<288x128xbf16, #tpu.memory_space<vmem>>, %arg7: memref<1x64xf32, #tpu.memory_space<vmem>>, %arg8: memref<128x64xbf16, #tpu.memory_space<vmem>>, %arg9: memref<1x64xf32, #tpu.memory_space<vmem>>, %arg10: memref<64x64xbf16, #tpu.memory_space<vmem>>, %arg11: memref<1x64xf32, #tpu.memory_space<vmem>>, %arg12: memref<64x10xbf16, #tpu.memory_space<vmem>>, %arg13: memref<1x10xf32, #tpu.memory_space<vmem>>, %arg14: memref<2x10xf32, #tpu.memory_space<vmem>>, %arg15: memref<20x80xf32, #tpu.memory_space<vmem>>, %arg16: memref<12x96xf32, #tpu.memory_space<vmem>>) attributes {dimension_semantics = [#tpu.dimension_semantics<arbitrary>], iteration_bounds = array<i64: 1>, scalar_prefetch = 0 : i64, scratch_operands = 2 : i64, tpu.core_type = #tpu.core_type<tc>, window_params = [{pipeline_mode = #tpu.pipeline_mode<synchronous>, transform_indices = @transform_0, window_bounds = array<i64: 36, 54>}, {pipeline_mode = #tpu.pipeline_mode<synchronous>, transform_indices = @transform_1, window_bounds = array<i64: 162, 128>}, {pipeline_mode = #tpu.pipeline_mode<synchronous>, transform_indices = @transform_2, window_bounds = array<i64: 1, 64>}, {pipeline_mode = #tpu.pipeline_mode<synchronous>, transform_indices = @transform_3, window_bounds = array<i64: 240, 128>}, {pipeline_mode = #tpu.pipeline_mode<synchronous>, transform_indices = @transform_4, window_bounds = array<i64: 1, 64>}, {pipeline_mode = #tpu.pipeline_mode<synchronous>, transform_indices = @transform_5, window_bounds = array<i64: 288, 128>}, {pipeline_mode = #tpu.pipeline_mode<synchronous>, transform_indices = @transform_6, window_bounds = array<i64: 1, 64>}, {pipeline_mode = #tpu.pipeline_mode<synchronous>, transform_indices = @transform_7, window_bounds = array<i64: 128, 64>}, {pipeline_mode = #tpu.pipeline_mode<synchronous>, transform_indices = @transform_8, window_bounds = array<i64: 1, 64>}, {pipeline_mode = #tpu.pipeline_mode<synchronous>, transform_indices = @transform_9, window_bounds = array<i64: 64, 64>}, {pipeline_mode = #tpu.pipeline_mode<synchronous>, transform_indices = @transform_10, window_bounds = array<i64: 1, 64>}, {pipeline_mode = #tpu.pipeline_mode<synchronous>, transform_indices = @transform_11, window_bounds = array<i64: 64, 10>}, {pipeline_mode = #tpu.pipeline_mode<synchronous>, transform_indices = @transform_12, window_bounds = array<i64: 1, 10>}, {pipeline_mode = #tpu.pipeline_mode<synchronous>, transform_indices = @transform_13, window_bounds = array<i64: 2, 10>}]} {
    %c0 = arith.constant 0 : index
    %c0_0 = arith.constant 0 : index
    %0 = tpu.strided_load %arg1[%c0, %c0_0] {strides = array<i32: 2, 1>} : memref<36x54xf32, #tpu.memory_space<vmem>>, vector<17x54xf32>
    %c1 = arith.constant 1 : index
    %c0_1 = arith.constant 0 : index
    %1 = tpu.strided_load %arg1[%c1, %c0_1] {strides = array<i32: 2, 1>} : memref<36x54xf32, #tpu.memory_space<vmem>>, vector<17x54xf32>
    %c2 = arith.constant 2 : index
    %c0_2 = arith.constant 0 : index
    %2 = tpu.strided_load %arg1[%c2, %c0_2] {strides = array<i32: 2, 1>} : memref<36x54xf32, #tpu.memory_space<vmem>>, vector<17x54xf32>
    %c3 = arith.constant 3 : index
    %c0_3 = arith.constant 0 : index
    %3 = tpu.strided_load %arg1[%c3, %c0_3] {strides = array<i32: 2, 1>} : memref<36x54xf32, #tpu.memory_space<vmem>>, vector<17x54xf32>
    %4 = tpu.concatenate %0, %1, %2 in 1 : vector<17x54xf32>, vector<17x54xf32>, vector<17x54xf32> -> vector<17x162xf32>
    %5 = tpu.concatenate %1, %2, %3 in 1 : vector<17x54xf32>, vector<17x54xf32>, vector<17x54xf32> -> vector<17x162xf32>
    %6 = tpu.concatenate %4, %5 in 0 : vector<17x162xf32>, vector<17x162xf32> -> vector<34x162xf32>
    %7 = arith.truncf %6 : vector<34x162xf32> to vector<34x162xbf16>
    %c0_4 = arith.constant 0 : index
    %c0_5 = arith.constant 0 : index
    %8 = vector.load %arg2[%c0_4, %c0_5] : memref<162x128xbf16, #tpu.memory_space<vmem>>, vector<162x128xbf16>
    %cst = arith.constant dense<0.000000e+00> : vector<34x128xf32>
    %9 = tpu.matmul %7, %8, %cst {dimension_numbers = #tpu.dot_dimension_numbers<[1], [0], [0], [1], [0, 0, 1, 1], [], []>} : vector<34x162xbf16>, vector<162x128xbf16>, vector<34x128xf32> -> vector<34x128xf32>
    %10 = vector.extract_strided_slice %9 {offsets = [0, 0], sizes = [17, 128], strides = [1, 1]} : vector<34x128xf32> to vector<17x128xf32>
    %11 = vector.extract_strided_slice %9 {offsets = [17, 0], sizes = [17, 128], strides = [1, 1]} : vector<34x128xf32> to vector<17x128xf32>
    %12 = arith.maximumf %10, %11 : vector<17x128xf32>
    %13 = vector.extract_strided_slice %12 {offsets = [0, 0], sizes = [17, 64], strides = [1, 1]} : vector<17x128xf32> to vector<17x64xf32>
    %14 = vector.extract_strided_slice %12 {offsets = [0, 64], sizes = [17, 64], strides = [1, 1]} : vector<17x128xf32> to vector<17x64xf32>
    %15 = arith.maximumf %13, %14 : vector<17x64xf32>
    %c0_6 = arith.constant 0 : index
    %c0_7 = arith.constant 0 : index
    %16 = vector.load %arg3[%c0_6, %c0_7] : memref<1x64xf32, #tpu.memory_space<vmem>>, vector<1x64xf32>
    %17 = vector.broadcast %16 : vector<1x64xf32> to vector<17x64xf32>
    %18 = arith.addf %15, %17 : vector<17x64xf32>
    %cst_8 = arith.constant 0.000000e+00 : f32
    %19 = vector.broadcast %cst_8 : f32 to vector<17x64xf32>
    %20 = arith.maximumf %18, %19 : vector<17x64xf32>
    %cst_9 = arith.constant 0.000000e+00 : f32
    %21 = vector.broadcast %cst_9 : f32 to vector<20x80xf32>
    %c0_10 = arith.constant 0 : index
    %c0_11 = arith.constant 0 : index
    %22 = vector.load %arg15[%c0_10, %c0_11] : memref<20x80xf32, #tpu.memory_space<vmem>>, vector<20x80xf32>
    tpu.vector_store %arg15[%c0_10, %c0_11], %21 {strides = array<i32>} : memref<20x80xf32, #tpu.memory_space<vmem>>, vector<20x80xf32>,
    %23 = vector.extract_strided_slice %20 {offsets = [0, 0], sizes = [8, 64], strides = [1, 1]} : vector<17x64xf32> to vector<8x64xf32>
    %c1_12 = arith.constant 1 : index
    %c8 = arith.constant 8 : index
    %24 = vector.load %arg15[%c1_12, %c8] : memref<20x80xf32, #tpu.memory_space<vmem>>, vector<8x64xf32>
    tpu.vector_store %arg15[%c1_12, %c8], %23 {strides = array<i32>} : memref<20x80xf32, #tpu.memory_space<vmem>>, vector<8x64xf32>,
    %25 = vector.extract_strided_slice %20 {offsets = [9, 0], sizes = [8, 64], strides = [1, 1]} : vector<17x64xf32> to vector<8x64xf32>
    %c11 = arith.constant 11 : index
    %c8_13 = arith.constant 8 : index
    %26 = vector.load %arg15[%c11, %c8_13] : memref<20x80xf32, #tpu.memory_space<vmem>>, vector<8x64xf32>
    tpu.vector_store %arg15[%c11, %c8_13], %25 {strides = array<i32>} : memref<20x80xf32, #tpu.memory_space<vmem>>, vector<8x64xf32>,
    %c0_14 = arith.constant 0 : index
    %c0_15 = arith.constant 0 : index
    %27 = tpu.strided_load %arg15[%c0_14, %c0_15] {strides = array<i32: 2, 1>} : memref<20x80xf32, #tpu.memory_space<vmem>>, vector<9x80xf32>
    %c1_16 = arith.constant 1 : index
    %c0_17 = arith.constant 0 : index
    %28 = tpu.strided_load %arg15[%c1_16, %c0_17] {strides = array<i32: 2, 1>} : memref<20x80xf32, #tpu.memory_space<vmem>>, vector<9x80xf32>
    %c2_18 = arith.constant 2 : index
    %c0_19 = arith.constant 0 : index
    %29 = tpu.strided_load %arg15[%c2_18, %c0_19] {strides = array<i32: 2, 1>} : memref<20x80xf32, #tpu.memory_space<vmem>>, vector<9x80xf32>
    %c3_20 = arith.constant 3 : index
    %c0_21 = arith.constant 0 : index
    %30 = tpu.strided_load %arg15[%c3_20, %c0_21] {strides = array<i32: 2, 1>} : memref<20x80xf32, #tpu.memory_space<vmem>>, vector<9x80xf32>
    %31 = tpu.concatenate %27, %28, %29 in 1 : vector<9x80xf32>, vector<9x80xf32>, vector<9x80xf32> -> vector<9x240xf32>
    %32 = tpu.concatenate %28, %29, %30 in 1 : vector<9x80xf32>, vector<9x80xf32>, vector<9x80xf32> -> vector<9x240xf32>
    %33 = tpu.concatenate %31, %32 in 0 : vector<9x240xf32>, vector<9x240xf32> -> vector<18x240xf32>
    %34 = arith.truncf %33 : vector<18x240xf32> to vector<18x240xbf16>
    %c0_22 = arith.constant 0 : index
    %c0_23 = arith.constant 0 : index
    %35 = vector.load %arg4[%c0_22, %c0_23] : memref<240x128xbf16, #tpu.memory_space<vmem>>, vector<240x128xbf16>
    %cst_24 = arith.constant dense<0.000000e+00> : vector<18x128xf32>
    %36 = tpu.matmul %34, %35, %cst_24 {dimension_numbers = #tpu.dot_dimension_numbers<[1], [0], [0], [1], [0, 0, 1, 1], [], []>} : vector<18x240xbf16>, vector<240x128xbf16>, vector<18x128xf32> -> vector<18x128xf32>
    %37 = vector.extract_strided_slice %36 {offsets = [0, 0], sizes = [9, 128], strides = [1, 1]} : vector<18x128xf32> to vector<9x128xf32>
    %38 = vector.extract_strided_slice %36 {offsets = [9, 0], sizes = [9, 128], strides = [1, 1]} : vector<18x128xf32> to vector<9x128xf32>
    %39 = arith.maximumf %37, %38 : vector<9x128xf32>
    %40 = vector.extract_strided_slice %39 {offsets = [0, 0], sizes = [9, 64], strides = [1, 1]} : vector<9x128xf32> to vector<9x64xf32>
    %41 = vector.extract_strided_slice %39 {offsets = [0, 64], sizes = [9, 64], strides = [1, 1]} : vector<9x128xf32> to vector<9x64xf32>
    %42 = arith.maximumf %40, %41 : vector<9x64xf32>
    %c0_25 = arith.constant 0 : index
    %c0_26 = arith.constant 0 : index
    %43 = vector.load %arg5[%c0_25, %c0_26] : memref<1x64xf32, #tpu.memory_space<vmem>>, vector<1x64xf32>
    %44 = vector.broadcast %43 : vector<1x64xf32> to vector<9x64xf32>
    %45 = arith.addf %42, %44 : vector<9x64xf32>
    %cst_27 = arith.constant 0.000000e+00 : f32
    %46 = vector.broadcast %cst_27 : f32 to vector<9x64xf32>
    %47 = arith.maximumf %45, %46 : vector<9x64xf32>
    %cst_28 = arith.constant 0.000000e+00 : f32
    %48 = vector.broadcast %cst_28 : f32 to vector<12x96xf32>
    %c0_29 = arith.constant 0 : index
    %c0_30 = arith.constant 0 : index
    %49 = vector.load %arg16[%c0_29, %c0_30] : memref<12x96xf32, #tpu.memory_space<vmem>>, vector<12x96xf32>
    tpu.vector_store %arg16[%c0_29, %c0_30], %48 {strides = array<i32>} : memref<12x96xf32, #tpu.memory_space<vmem>>, vector<12x96xf32>,
    %50 = vector.extract_strided_slice %47 {offsets = [0, 0], sizes = [4, 64], strides = [1, 1]} : vector<9x64xf32> to vector<4x64xf32>
    %c1_31 = arith.constant 1 : index
    %c16 = arith.constant 16 : index
    %51 = vector.load %arg16[%c1_31, %c16] : memref<12x96xf32, #tpu.memory_space<vmem>>, vector<4x64xf32>
    tpu.vector_store %arg16[%c1_31, %c16], %50 {strides = array<i32>} : memref<12x96xf32, #tpu.memory_space<vmem>>, vector<4x64xf32>,
    %52 = vector.extract_strided_slice %47 {offsets = [5, 0], sizes = [4, 64], strides = [1, 1]} : vector<9x64xf32> to vector<4x64xf32>
    %c7 = arith.constant 7 : index
    %c16_32 = arith.constant 16 : index
    %53 = vector.load %arg16[%c7, %c16_32] : memref<12x96xf32, #tpu.memory_space<vmem>>, vector<4x64xf32>
    tpu.vector_store %arg16[%c7, %c16_32], %52 {strides = array<i32>} : memref<12x96xf32, #tpu.memory_space<vmem>>, vector<4x64xf32>,
    %c0_33 = arith.constant 0 : index
    %c0_34 = arith.constant 0 : index
    %54 = tpu.strided_load %arg16[%c0_33, %c0_34] {strides = array<i32: 2, 1>} : memref<12x96xf32, #tpu.memory_space<vmem>>, vector<5x96xf32>
    %c1_35 = arith.constant 1 : index
    %c0_36 = arith.constant 0 : index
    %55 = tpu.strided_load %arg16[%c1_35, %c0_36] {strides = array<i32: 2, 1>} : memref<12x96xf32, #tpu.memory_space<vmem>>, vector<5x96xf32>
    %c2_37 = arith.constant 2 : index
    %c0_38 = arith.constant 0 : index
    %56 = tpu.strided_load %arg16[%c2_37, %c0_38] {strides = array<i32: 2, 1>} : memref<12x96xf32, #tpu.memory_space<vmem>>, vector<5x96xf32>
    %c3_39 = arith.constant 3 : index
    %c0_40 = arith.constant 0 : index
    %57 = tpu.strided_load %arg16[%c3_39, %c0_40] {strides = array<i32: 2, 1>} : memref<12x96xf32, #tpu.memory_space<vmem>>, vector<5x96xf32>
    %58 = tpu.concatenate %54, %55, %56 in 1 : vector<5x96xf32>, vector<5x96xf32>, vector<5x96xf32> -> vector<5x288xf32>
    %59 = tpu.concatenate %55, %56, %57 in 1 : vector<5x96xf32>, vector<5x96xf32>, vector<5x96xf32> -> vector<5x288xf32>
    %60 = tpu.concatenate %58, %59 in 0 : vector<5x288xf32>, vector<5x288xf32> -> vector<10x288xf32>
    %61 = arith.truncf %60 : vector<10x288xf32> to vector<10x288xbf16>
    %c0_41 = arith.constant 0 : index
    %c0_42 = arith.constant 0 : index
    %62 = vector.load %arg6[%c0_41, %c0_42] : memref<288x128xbf16, #tpu.memory_space<vmem>>, vector<288x128xbf16>
    %cst_43 = arith.constant dense<0.000000e+00> : vector<10x128xf32>
    %63 = tpu.matmul %61, %62, %cst_43 {dimension_numbers = #tpu.dot_dimension_numbers<[1], [0], [0], [1], [0, 0, 1, 1], [], []>} : vector<10x288xbf16>, vector<288x128xbf16>, vector<10x128xf32> -> vector<10x128xf32>
    %64 = vector.extract_strided_slice %63 {offsets = [0, 0], sizes = [5, 128], strides = [1, 1]} : vector<10x128xf32> to vector<5x128xf32>
    %65 = vector.extract_strided_slice %63 {offsets = [5, 0], sizes = [5, 128], strides = [1, 1]} : vector<10x128xf32> to vector<5x128xf32>
    %66 = arith.maximumf %64, %65 : vector<5x128xf32>
    %67 = vector.extract_strided_slice %66 {offsets = [0, 0], sizes = [5, 64], strides = [1, 1]} : vector<5x128xf32> to vector<5x64xf32>
    %68 = vector.extract_strided_slice %66 {offsets = [0, 64], sizes = [5, 64], strides = [1, 1]} : vector<5x128xf32> to vector<5x64xf32>
    %69 = arith.maximumf %67, %68 : vector<5x64xf32>
    %c0_44 = arith.constant 0 : index
    %c0_45 = arith.constant 0 : index
    %70 = vector.load %arg7[%c0_44, %c0_45] : memref<1x64xf32, #tpu.memory_space<vmem>>, vector<1x64xf32>
    %71 = vector.broadcast %70 : vector<1x64xf32> to vector<5x64xf32>
    %72 = arith.addf %69, %71 : vector<5x64xf32>
    %cst_46 = arith.constant 0.000000e+00 : f32
    %73 = vector.broadcast %cst_46 : f32 to vector<5x64xf32>
    %74 = arith.maximumf %72, %73 : vector<5x64xf32>
    %c0_47 = arith.constant 0 : index
    %c0_48 = arith.constant 0 : index
    %75 = vector.load %arg9[%c0_47, %c0_48] : memref<1x64xf32, #tpu.memory_space<vmem>>, vector<1x64xf32>
    %76 = vector.extract_strided_slice %74 {offsets = [0, 0], sizes = [1, 64], strides = [1, 1]} : vector<5x64xf32> to vector<1x64xf32>
    %77 = vector.extract_strided_slice %74 {offsets = [3, 0], sizes = [1, 64], strides = [1, 1]} : vector<5x64xf32> to vector<1x64xf32>
    %78 = tpu.concatenate %76, %77 in 0 : vector<1x64xf32>, vector<1x64xf32> -> vector<2x64xf32>
    %79 = arith.truncf %78 : vector<2x64xf32> to vector<2x64xbf16>
    %c0_49 = arith.constant 0 : index
    %c0_50 = arith.constant 0 : index
    %80 = vector.load %arg8[%c0_49, %c0_50] : memref<128x64xbf16, #tpu.memory_space<vmem>>, vector<64x64xbf16>
    %cst_51 = arith.constant dense<0.000000e+00> : vector<2x64xf32>
    %81 = tpu.matmul %79, %80, %cst_51 {dimension_numbers = #tpu.dot_dimension_numbers<[1], [0], [0], [1], [0, 0, 1, 1], [], []>} : vector<2x64xbf16>, vector<64x64xbf16>, vector<2x64xf32> -> vector<2x64xf32>
    %82 = vector.broadcast %75 : vector<1x64xf32> to vector<2x64xf32>
    %83 = arith.addf %82, %81 : vector<2x64xf32>
    %84 = vector.extract_strided_slice %74 {offsets = [1, 0], sizes = [1, 64], strides = [1, 1]} : vector<5x64xf32> to vector<1x64xf32>
    %85 = vector.extract_strided_slice %74 {offsets = [4, 0], sizes = [1, 64], strides = [1, 1]} : vector<5x64xf32> to vector<1x64xf32>
    %86 = tpu.concatenate %84, %85 in 0 : vector<1x64xf32>, vector<1x64xf32> -> vector<2x64xf32>
    %87 = arith.truncf %86 : vector<2x64xf32> to vector<2x64xbf16>
    %c64 = arith.constant 64 : index
    %c0_52 = arith.constant 0 : index
    %88 = vector.load %arg8[%c64, %c0_52] : memref<128x64xbf16, #tpu.memory_space<vmem>>, vector<64x64xbf16>
    %cst_53 = arith.constant dense<0.000000e+00> : vector<2x64xf32>
    %89 = tpu.matmul %87, %88, %cst_53 {dimension_numbers = #tpu.dot_dimension_numbers<[1], [0], [0], [1], [0, 0, 1, 1], [], []>} : vector<2x64xbf16>, vector<64x64xbf16>, vector<2x64xf32> -> vector<2x64xf32>
    %90 = arith.addf %83, %89 : vector<2x64xf32>
    %cst_54 = arith.constant 0.000000e+00 : f32
    %91 = vector.broadcast %cst_54 : f32 to vector<2x64xf32>
    %92 = arith.maximumf %90, %91 : vector<2x64xf32>
    %93 = arith.truncf %92 : vector<2x64xf32> to vector<2x64xbf16>
    %c0_55 = arith.constant 0 : index
    %c0_56 = arith.constant 0 : index
    %94 = vector.load %arg10[%c0_55, %c0_56] : memref<64x64xbf16, #tpu.memory_space<vmem>>, vector<64x64xbf16>
    %cst_57 = arith.constant dense<0.000000e+00> : vector<2x64xf32>
    %95 = tpu.matmul %93, %94, %cst_57 {dimension_numbers = #tpu.dot_dimension_numbers<[1], [0], [0], [1], [0, 0, 1, 1], [], []>} : vector<2x64xbf16>, vector<64x64xbf16>, vector<2x64xf32> -> vector<2x64xf32>
    %c0_58 = arith.constant 0 : index
    %c0_59 = arith.constant 0 : index
    %96 = vector.load %arg11[%c0_58, %c0_59] : memref<1x64xf32, #tpu.memory_space<vmem>>, vector<1x64xf32>
    %97 = vector.broadcast %96 : vector<1x64xf32> to vector<2x64xf32>
    %98 = arith.addf %95, %97 : vector<2x64xf32>
    %cst_60 = arith.constant 0.000000e+00 : f32
    %99 = vector.broadcast %cst_60 : f32 to vector<2x64xf32>
    %100 = arith.maximumf %98, %99 : vector<2x64xf32>
    %101 = arith.truncf %100 : vector<2x64xf32> to vector<2x64xbf16>
    %c0_61 = arith.constant 0 : index
    %c0_62 = arith.constant 0 : index
    %102 = vector.load %arg12[%c0_61, %c0_62] : memref<64x10xbf16, #tpu.memory_space<vmem>>, vector<64x10xbf16>
    %cst_63 = arith.constant dense<0.000000e+00> : vector<2x10xf32>
    %103 = tpu.matmul %101, %102, %cst_63 {dimension_numbers = #tpu.dot_dimension_numbers<[1], [0], [0], [1], [0, 0, 1, 1], [], []>} : vector<2x64xbf16>, vector<64x10xbf16>, vector<2x10xf32> -> vector<2x10xf32>
    %c0_64 = arith.constant 0 : index
    %c0_65 = arith.constant 0 : index
    %104 = vector.load %arg13[%c0_64, %c0_65] : memref<1x10xf32, #tpu.memory_space<vmem>>, vector<1x10xf32>
    %105 = vector.broadcast %104 : vector<1x10xf32> to vector<2x10xf32>
    %106 = arith.addf %103, %105 : vector<2x10xf32>
    %c0_66 = arith.constant 0 : index
    %c0_67 = arith.constant 0 : index
    %107 = vector.load %arg14[%c0_66, %c0_67] : memref<2x10xf32, #tpu.memory_space<vmem>>, vector<2x10xf32>
    tpu.vector_store %arg14[%c0_66, %c0_67], %106 {strides = array<i32>} : memref<2x10xf32, #tpu.memory_space<vmem>>, vector<2x10xf32>,
    return
  }
  func.func @transform_0(%arg0: i32) -> (i32, i32) {
    %c0_i32 = arith.constant 0 : i32
    %c0_i32_0 = arith.constant 0 : i32
    %c0_i32_1 = arith.constant 0 : i32
    return %c0_i32, %c0_i32_0 : i32, i32
  }
  func.func @transform_1(%arg0: i32) -> (i32, i32) {
    %c0_i32 = arith.constant 0 : i32
    %c0_i32_0 = arith.constant 0 : i32
    %c0_i32_1 = arith.constant 0 : i32
    return %c0_i32, %c0_i32_0 : i32, i32
  }
  func.func @transform_2(%arg0: i32) -> (i32, i32) {
    %c0_i32 = arith.constant 0 : i32
    %c0_i32_0 = arith.constant 0 : i32
    %c0_i32_1 = arith.constant 0 : i32
    return %c0_i32, %c0_i32_0 : i32, i32
  }
  func.func @transform_3(%arg0: i32) -> (i32, i32) {
    %c0_i32 = arith.constant 0 : i32
    %c0_i32_0 = arith.constant 0 : i32
    %c0_i32_1 = arith.constant 0 : i32
    return %c0_i32, %c0_i32_0 : i32, i32
  }
  func.func @transform_4(%arg0: i32) -> (i32, i32) {
    %c0_i32 = arith.constant 0 : i32
    %c0_i32_0 = arith.constant 0 : i32
    %c0_i32_1 = arith.constant 0 : i32
    return %c0_i32, %c0_i32_0 : i32, i32
  }
  func.func @transform_5(%arg0: i32) -> (i32, i32) {
    %c0_i32 = arith.constant 0 : i32
    %c0_i32_0 = arith.constant 0 : i32
    %c0_i32_1 = arith.constant 0 : i32
    return %c0_i32, %c0_i32_0 : i32, i32
  }
  func.func @transform_6(%arg0: i32) -> (i32, i32) {
    %c0_i32 = arith.constant 0 : i32
    %c0_i32_0 = arith.constant 0 : i32
    %c0_i32_1 = arith.constant 0 : i32
    return %c0_i32, %c0_i32_0 : i32, i32
  }
  func.func @transform_7(%arg0: i32) -> (i32, i32) {
    %c0_i32 = arith.constant 0 : i32
    %c0_i32_0 = arith.constant 0 : i32
    %c0_i32_1 = arith.constant 0 : i32
    return %c0_i32, %c0_i32_0 : i32, i32
  }
  func.func @transform_8(%arg0: i32) -> (i32, i32) {
    %c0_i32 = arith.constant 0 : i32
    %c0_i32_0 = arith.constant 0 : i32
    %c0_i32_1 = arith.constant 0 : i32
    return %c0_i32, %c0_i32_0 : i32, i32
  }
  func.func @transform_9(%arg0: i32) -> (i32, i32) {
    %c0_i32 = arith.constant 0 : i32
    %c0_i32_0 = arith.constant 0 : i32
    %c0_i32_1 = arith.constant 0 : i32
    return %c0_i32, %c0_i32_0 : i32, i32
  }
  func.func @transform_10(%arg0: i32) -> (i32, i32) {
    %c0_i32 = arith.constant 0 : i32
    %c0_i32_0 = arith.constant 0 : i32
    %c0_i32_1 = arith.constant 0 : i32
    return %c0_i32, %c0_i32_0 : i32, i32
  }
  func.func @transform_11(%arg0: i32) -> (i32, i32) {
    %c0_i32 = arith.constant 0 : i32
    %c0_i32_0 = arith.constant 0 : i32
    %c0_i32_1 = arith.constant 0 : i32
    return %c0_i32, %c0_i32_0 : i32, i32
  }
  func.func @transform_12(%arg0: i32) -> (i32, i32) {
    %c0_i32 = arith.constant 0 : i32
    %c0_i32_0 = arith.constant 0 : i32
    %c0_i32_1 = arith.constant 0 : i32
    return %c0_i32, %c0_i32_0 : i32, i32
  }
  func.func @transform_13(%arg0: i32) -> (i32, i32) {
    %c0_i32 = arith.constant 0 : i32
    %c0_i32_0 = arith.constant 0 : i32
    %c0_i32_1 = arith.constant 0 : i32
    return %c0_i32, %c0_i32_0 : i32, i32
  }
}

</mosaic_0001>

<bundles_post_ra>
// kernel: vgg_forward.1
= control target key start
LH: loop header
LB: loop body
LE: loop exit
PB: predicated region body
PF: predicated region fallthrough
CT: control target
= control target key end

     0   :  { %s1531_s18 = smov 54   ;;  %s1923_s0 = inlined_call_operand.vmem [shape: f32[36,54], index: 0, kind: input, shape index: {}]   ;;  %s1924_s1 = inlined_call_operand.vmem [shape: bf16[162,128], index: 1, kind: input, shape index: {}]   ;;  %s1925_s2 = inlined_call_operand.vmem [shape: f32[1,64], index: 2, kind: input, shape index: {}]   ;;  %s1926_s3 = inlined_call_operand.vmem [shape: bf16[240,128], index: 3, kind: input, shape index: {}]   ;;  %s1927_s4 = inlined_call_operand.vmem [shape: f32[1,64], index: 4, kind: input, shape index: {}]   ;;  %s1928_s5 = inlined_call_operand.vmem [shape: bf16[288,128], index: 5, kind: input, shape index: {}]   ;;  %s1929_s6 = inlined_call_operand.vmem [shape: f32[1,64], index: 6, kind: input, shape index: {}]   ;;  %s1930_s7 = inlined_call_operand.vmem [shape: bf16[128,64], index: 7, kind: input, shape index: {}]   ;;  %s1931_s8 = inlined_call_operand.vmem [shape: f32[1,64], index: 8, kind: input, shape index: {}]   ;;  %s1932_s9 = inlined_call_operand.vmem [shape: bf16[64,64], index: 9, kind: input, shape index: {}]   ;;  %s1933_s10 = inlined_call_operand.vmem [shape: f32[1,64], index: 10, kind: input, shape index: {}]   ;;  %s1934_s11 = inlined_call_operand.vmem [shape: bf16[64,10], index: 11, kind: input, shape index: {}]   ;;  %s1935_s12 = inlined_call_operand.vmem [shape: f32[1,10], index: 12, kind: input, shape index: {}]   ;;  %s1936_s13 = inlined_call_operand.hbm [shape: f32[2,10], index: 13, kind: output, shape index: {}]  }
   0x1   :  { %v1614_v0 = vld [vmem:[%s1923_s0 + $0x1] ss:$2 sm:$0xff]  ;;  %v1619_v1 = vld [vmem:[%s1923_s0 + $0x11] ss:$2 sm:$0xff]  ;;  %v1138_v3 = vld [vmem:[%s1923_s0 + $0x2] ss:$2 sm:$0xff] }
   0x2   :  { %v1459_v2 = vpack.i.bf16 %v1619_v1, %v1614_v0  ;;  %v1139_v4 = vld [vmem:[%s1923_s0 + $0x12] ss:$2 sm:$0xff]  ;;  %v1635_v7 = vld [vmem:[%s1923_s0 + $0x21] ss:$2 sm:$0x1] }
   0x3   :  { %v1469_v5 = vpack.i.bf16 %v1139_v4, %v1138_v3  ;;  %v1397_v6 = vld [vmem:[%s1924_s1 + $0x38] sm:$0xff]  ;;  %v1141_v8 = vld [vmem:[%s1923_s0 + $0x3] ss:$2 sm:$0xff]  ;;  %76 = vrot.lane.b32.xlu2 %v1635_v7, %s1531_s18 }
   0x4   :  { %1460 = vrot.lane.b32.xlu0 %v1459_v2, %s1531_s18  ;;  %v1142_v9 = vld [vmem:[%s1923_s0 + $0x13] ss:$2 sm:$0xff]  ;;  %253 = vmatpush.bf16.msra.mxu0 %v1397_v6 }
   0x5   :  { %1470 = vrot.lane.b32.xlu1 %v1469_v5, %s1531_s18  ;;  %v1396_v10 = vld [vmem:[%s1924_s1 + $0x30] sm:$0xff] }
   0x6   :  { %18 = vsyncpa [#allocation5], 0  ;;  %v1474_v11 = vpack.i.bf16 %v1142_v9, %v1141_v8  ;;  %v1395_v12 = vld [vmem:[%s1924_s1 + $0x28] sm:$0xff]  ;;  %s1532_s29 = smov 108   ;;  %v1394_v14 = vld [vmem:[%s1924_s1 + $0x20] sm:$0xff]  ;;  %vm131_vm0 = vcmask 1040384  }
   0x7   :  { %v1140_v13 = vld [vmem:[%s1923_s0 + $0x22] ss:$2 sm:$0x1]  ;;  %v1143_v15 = vld [vmem:[%s1923_s0 + $0x23] ss:$2 sm:$0x1] }
   0x8   :  { %254 = vmatpush.bf16.msra.mxu0 %v1396_v10  ;;  %v1393_v16 = vld [vmem:[%s1924_s1 + $0x18] sm:$0xff]  ;;  %v176_v17 = vld [vmem:[%s1924_s1 + $0x50] sm:$0x1]  ;;  %v1399_v22 = vld [vmem:[%s1924_s1 + $0x48] sm:$0xff]  ;;  %vm93_vm1 = vcmask 441344   ;;  %vm97_vm2 = vcmask 883712  }
   0x9   :  { %v218_v18 = vunpack.c.l.b16 %v176_v17  ;;  %v1392_v21 = vld [vmem:[%s1924_s1 + $0x10] sm:$0xff]  ;;  %v1391_v23 = vld [vmem:[%s1924_s1 + $0x8] sm:$0xff]  ;;  %v1398_v24 = vld [vmem:[%s1924_s1 + $0x40] sm:$0xff]  ;;  %vm240_vm3 = vcmask 277504   ;;  %vm302_vm4 = vcmask 1046528   ;;  %s1534_s24 = smov 8  }
   0xa   :  { %v1390_v25 = vld [vmem:[%s1924_s1] sm:$0xff]  ;;  %v1133_v31 = vld [vmem:[%s1923_s0 + $0x10] ss:$2 sm:$0xff]  ;;  %vm339_vm5 = vcmask 654336   ;;  %vm342_vm6 = vcmask 650240   ;;  %vm348_vm7 = vcmask 588864  }
   0xb   :  { %88 = vrot.lane.b32.xlu2 %v1140_v13, %s1532_s29  ;;  %v229_v19 = vpack.c.b16 %v218_v18, %v218_v18  ;;  %v46_v30 = vld [vmem:[%s1923_s0] ss:$2 sm:$0xff]  ;;  %vm360_vm8 = vcmask 581696   ;;  %vm358_vm9 = vcmask 588865   ;;  %s1537_s28 = smov 32   ;;  %vm395_vm10 = vcmask 261120  }
   0xc   :  { %1465 = vrot.lane.b32.xlu0 %v1469_v5, %s1532_s29  ;;  %255 = vmatpush.bf16.msra.mxu0 %v1395_v12  ;;  %v1134_v49 = vld [vmem:[%s1923_s0 + $0x20] ss:$2 sm:$0x1]  ;;  %s1533_s0 = smov 64   ;;  %vm556_vm11 = vcmask 916480   ;;  %vm628_vm12 = vcmask 781312  }
   0xd   :  { %1475 = vrot.lane.b32.xlu1 %v1474_v11, %s1532_s29  ;;  %v251_v20 = vsel %vm131_vm0, %v229_v19, 0  ;;  %s1538_s1 = smov 16   ;;  %vm626_vm13 = vcmask 785408   ;;  %vm642_vm14 = vcmask 647296   ;;  %vm634_vm15 = vcmask 650368   ;;  %s1539_s26 = smov 96  }
   0xe   :  { %281 = vmatpush.bf16.msra.mxu1 %v251_v20 }
  0x10   :  { %256 = vmatpush.bf16.msra.mxu0 %v1394_v14 }
  0x12   :  { %282 = vmatpush.bf16.msra.mxu1 %v1399_v22 }
  0x14   :  { %105 = vrot.lane.b32.xlu0 %v1140_v13, %s1531_s18  ;;  %257 = vmatpush.bf16.msra.mxu0 %v1393_v16  ;;  %s1536_s18 = smov 80  }
  0x15   :  { %117 = vrot.lane.b32.xlu1 %v1143_v15, %s1532_s29 }
  0x16   :  { %283 = vmatpush.bf16.msra.mxu1 %v1398_v24 }
  0x18   :  { %258 = vmatpush.bf16.msra.mxu0 %v1392_v21 }
  0x1c   :  { %259 = vmatpush.bf16.msra.mxu0 %v1391_v23 }
  0x20   :  { %260 = vmatpush.bf16.msra.mxu0 %v1390_v25 }
  0x5d   :  { %v77_v35 = vpop.permute.xlu2 %76 }
  0x5e   :  { %v96_v54 = vsel %vm93_vm1, %v1134_v49, %v77_v35 }
  0x65   :  { %v89_v55 = vpop.permute.xlu2 %88 }
  0x66   :  { %v100_v60 = vsel %vm97_vm2, %v96_v54, %v89_v55 }
  0x76   :  { %v1461_v26 = vpop.permute.xlu0 %1460 }
  0x77   :  { %v1471_v27 = vpop.permute.xlu1 %1470  ;;  %v1463_v28 = vunpack.i.h.bf16 %v1461_v26  ;;  %v1462_v29 = vunpack.i.l.bf16 %v1461_v26 }
  0x78   :  { %v1473_v41 = vunpack.i.h.bf16 %v1471_v27  ;;  %v1472_v42 = vunpack.i.l.bf16 %v1471_v27 }
  0x79   :  { %v94_v36 = vsel %vm93_vm1, %v46_v30, %v1462_v29  ;;  %v95_v37 = vsel %vm93_vm1, %v1133_v31, %v1463_v28 }
  0x7a   :  { %v122_v47 = vsel %vm93_vm1, %v1614_v0, %v1472_v42  ;;  %v123_v48 = vsel %vm93_vm1, %v1619_v1, %v1473_v41  ;;  %v1535_v41 = vmov 0.0  }
  0x7b   :  { %340 = vst.msk [vmem:[#allocation2] sm:$0xff] %vm339_vm5, %v1535_v41 }
  0x7c   :  { %341 = vst.msk [vmem:[#allocation2 + $0x8] sm:$0xff] %vm339_vm5, %v1535_v41 }
  0x7d   :  { %343 = vst.msk [vmem:[#allocation2 + $0x10] sm:$0xf] %vm342_vm6, %v1535_v41 }
  0x7e   :  { %v1466_v32 = vpop.permute.xlu0 %1465  ;;  %629 = vst.msk [vmem:[#allocation3 + $0x8] sm:$0xf] %vm628_vm12, %v1535_v41 }
  0x7f   :  { %v1468_v33 = vunpack.i.h.bf16 %v1466_v32  ;;  %v1467_v34 = vunpack.i.l.bf16 %v1466_v32  ;;  %v1476_v44 = vpop.permute.xlu1 %1475  ;;  %627 = vst.msk [vmem:[#allocation3] sm:$0xff] %vm626_vm13, %v1535_v41  ;;  %v1429_v41 = vld [vmem:[%s1928_s5 + $0x70] sm:$0xff] }
  0x80   :  { %v1478_v45 = vunpack.i.h.bf16 %v1476_v44  ;;  %v1477_v46 = vunpack.i.l.bf16 %v1476_v44 }
  0x81   :  { %v151_v38 = vpack.c.bf16 %v1468_v33, %v1467_v34  ;;  %v98_v39 = vsel %vm97_vm2, %v94_v36, %v1467_v34  ;;  %v99_v40 = vsel %vm97_vm2, %v95_v37, %v1468_v33  ;;  %v1499_v36 = vld [vmem:[%s1925_s2] ss:$0 sm:$0xff] }
  0x82   :  { %v150_v43 = vpack.c.bf16 %v99_v40, %v98_v39  ;;  %v136_v50 = vrot.slane %v1478_v45, 7  ;;  %v133_v51 = vrot.slane %v1477_v46, 7  ;;  %v125_v52 = vsel %vm97_vm2, %v122_v47, %v1477_v46 }
  0x83   :  { %1184 = vmatmul.msk.bf16.vlgmr.msra.gmra.mxu1 %vm240_vm3, %v151_v38  ;;  %v126_v53 = vsel %vm97_vm2, %v123_v48, %v1478_v45  ;;  %v132_v56 = vrot.slane %v125_v52, 7  ;;  %v1406_v52 = vld [vmem:[%s1926_s3 + $0x30] sm:$0xff] }
  0x84   :  { %261 = vmatmul.bf16.vlgmr.msra.gmra.mxu0 %v150_v43  ;;  %v134_v57 = vrot.slane %v126_v53, 7  ;;  %v137_v58 = vsel %vm131_vm0, %v133_v51, %v136_v50  ;;  %v149_v59 = vsel %vm131_vm0, %v89_v55, %v133_v51  ;;  %v1407_v51 = vld [vmem:[%s1926_s3 + $0x38] sm:$0xff] }
  0x85   :  { %v153_v61 = vpack.c.bf16 %v137_v58, %v149_v59  ;;  %v148_v63 = vsel %vm131_vm0, %v100_v60, %v132_v56  ;;  %563 = vmatpush.bf16.msra.mxu2 %v1407_v51 }
  0x86   :  { %v135_v62 = vsel %vm131_vm0, %v132_v56, %v134_v57  ;;  %v106_v0 = vpop.permute.xlu0 %105 }
  0x87   :  { %v152_v1 = vpack.c.bf16 %v135_v62, %v148_v63  ;;  %v124_v2 = vsel %vm93_vm1, %v1635_v7, %v106_v0  ;;  %v118_v3 = vpop.permute.xlu1 %117  ;;  %v376_v62 = vld [vmem:[#allocation2 + $0x13] ss:$2 sm:$0x1]  ;;  %v1405_v63 = vld [vmem:[%s1926_s3 + $0x28] sm:$0xff]  ;;  %vm640_vm1 = vcmask 654469  }
  0x88   :  { %v127_v4 = vsel %vm97_vm2, %v124_v2, %v118_v3  ;;  %v140_v5 = vrot.slane %v118_v3, 7  ;;  %v1414_v0 = vld [vmem:[%s1926_s3 + $0x70] sm:$0xff]  ;;  %v1413_v2 = vld [vmem:[%s1926_s3 + $0x68] sm:$0xff]  ;;  %v1403_v3 = vld [vmem:[%s1926_s3 + $0x18] sm:$0xff]  ;;  %vm660_vm2 = vcmask 523264  }
  0x89   :  { %v138_v6 = vrot.slane %v127_v4, 7  ;;  %564 = vmatpush.bf16.msra.mxu2 %v1406_v52  ;;  %582 = vmatpush.bf16.msra.mxu3 %v1414_v0  ;;  %v1412_v4 = vld [vmem:[%s1926_s3 + $0x60] sm:$0xff] }
  0x8a   :  { %v141_v8 = vsel %vm131_vm0, %v136_v50, %v140_v5  ;;  %v1402_v5 = vld [vmem:[%s1926_s3 + $0x10] sm:$0xff] }
  0x8b   :  { %v139_v9 = vsel %vm131_vm0, %v134_v57, %v138_v6  ;;  %v155_v10 = vpack.c.bf16 %v141_v8, %v141_v8  ;;  %v1411_v6 = vld [vmem:[%s1926_s3 + $0x58] sm:$0xff]  ;;  %v1401_v8 = vld [vmem:[%s1926_s3 + $0x8] sm:$0xff] }
  0x8c   :  { %v154_v11 = vpack.c.bf16 %v139_v9, %v139_v9  ;;  %v1410_v9 = vld [vmem:[%s1926_s3 + $0x50] sm:$0xff] }
  0x8d   :  { %565 = vmatpush.bf16.msra.mxu2 %v1405_v63  ;;  %583 = vmatpush.bf16.msra.mxu3 %v1413_v2 }
  0x91   :  { %584 = vmatpush.bf16.msra.mxu3 %v1412_v4 }
  0x93   :  { %1185 = vmatmul.msk.bf16.gmra.mxu1 %vm240_vm3, %v153_v61 }
  0x94   :  { %266 = vmatmul.bf16.gmra.mxu0 %v152_v1  ;;  %v1404_v1 = vld [vmem:[%s1926_s3 + $0x20] sm:$0xff] }
  0x95   :  { %566 = vmatpush.bf16.msra.mxu2 %v1404_v1  ;;  %585 = vmatpush.bf16.msra.mxu3 %v1411_v6  ;;  %v1422_v6 = vld [vmem:[%s1928_s5 + $0x38] sm:$0xff] }
  0x96   :  { %833 = vmatpush.bf16.msrb.mxu1 %v1422_v6  ;;  %v1434_v6 = vld [vmem:[%s1930_s7 + $0x8] sm:$0xff] }
  0x99   :  { %567 = vmatpush.bf16.msra.mxu2 %v1403_v3  ;;  %586 = vmatpush.bf16.msra.mxu3 %v1410_v9  ;;  %v1432_v9 = vld [vmem:[%s1928_s5 + $0x88] sm:$0xff] }
  0x9d   :  { %568 = vmatpush.bf16.msra.mxu2 %v1402_v5 }
  0xa1   :  { %569 = vmatpush.bf16.msra.mxu2 %v1401_v8  ;;  %v1430_v8 = vld [vmem:[%s1928_s5 + $0x78] sm:$0xff] }
  0xa3   :  { %1186 = vmatmul.msk.bf16.gmra.mxu1 %vm240_vm3, %v155_v10  ;;  %v1400_v10 = vld [vmem:[%s1926_s3] sm:$0xff]  ;;  %vm679_vm3 = vcmask 1044480  }
  0xa4   :  { %271 = vmatmul.bf16.gmra.mxu0 %v154_v11  ;;  %v1409_v11 = vld [vmem:[%s1926_s3 + $0x48] sm:$0xff] }
  0xa5   :  { %570 = vmatpush.bf16.msra.mxu2 %v1400_v10  ;;  %587 = vmatpush.bf16.msra.mxu3 %v1409_v11  ;;  %v1421_v10 = vld [vmem:[%s1928_s5 + $0x30] sm:$0xff]  ;;  %v1431_v11 = vld [vmem:[%s1928_s5 + $0x80] sm:$0xff] }
  0xa6   :  { %834 = vmatpush.bf16.msrb.mxu1 %v1421_v10  ;;  %v1444_v10 = vld [vmem:[%s1932_s9 + $0x18] sm:$0xff] }
  0xa7   :  { %1052 = vmatpush.bf16.msrb.mxu0 %v1444_v10 }
  0xa9   :  { %867 = vmatpush.bf16.msrb.mxu2 %v1432_v9  ;;  %v1433_v9 = vld [vmem:[%s1930_s7] sm:$0xff] }
  0xad   :  { %868 = vmatpush.bf16.msrb.mxu2 %v1431_v11  ;;  %v1442_v11 = vld [vmem:[%s1932_s9 + $0x8] sm:$0xff] }
 0x100   :  { %v285_v12 = vpop.f32.mrf.mxu1 }
 0x101   :  { %v262_v13 = vpop.f32.mrf.mxu0 }
 0x102   :  { %v286_v23 = vadd.f32 %v285_v12, %v262_v13  ;;  %v1408_v12 = vld [vmem:[%s1926_s3 + $0x40] sm:$0xff] }
 0x103   :  { %588 = vmatpush.bf16.msra.mxu3 %v1408_v12  ;;  %v1420_v12 = vld [vmem:[%s1928_s5 + $0x28] sm:$0xff] }
 0x104   :  { %835 = vmatpush.bf16.msrb.mxu1 %v1420_v12  ;;  %v1501_v12 = vld [vmem:[%s1929_s6] ss:$0 sm:$0xff] }
 0x107   :  { %847 = vmatpush.bf16.msrb.mxu3 %v1430_v8  ;;  %v1437_v8 = vld [vmem:[%s1930_s7 + $0x20] sm:$0xff] }
 0x108   :  { %v287_v14 = vpop.f32.mrf.mxu1 }
 0x109   :  { %v264_v15 = vpop.f32.mrf.mxu0 }
 0x10a   :  { %v288_v30 = vadd.f32 %v287_v14, %v264_v15 }
 0x10b   :  { %848 = vmatpush.bf16.msrb.mxu3 %v1429_v41  ;;  %v1443_v41 = vld [vmem:[%s1932_s9 + $0x10] sm:$0xff] }
 0x10c   :  { %1053 = vmatpush.bf16.msrb.mxu0 %v1443_v41 }
 0x110   :  { %v290_v16 = vpop.f32.mrf.mxu1  ;;  %1054 = vmatpush.bf16.msrb.mxu0 %v1442_v11 }
 0x111   :  { %v267_v7 = vpop.f32.mrf.mxu0 }
 0x112   :  { %v291_v18 = vadd.f32 %v290_v16, %v267_v7 }
 0x114   :  { %v303_v21 = vrot.slane %v291_v18, 1 }
 0x118   :  { %v292_v17 = vpop.f32.mrf.mxu1 }
 0x119   :  { %v269_v19 = vpop.f32.mrf.mxu0 }
 0x11a   :  { %v293_v20 = vadd.f32 %v292_v17, %v269_v19 }
 0x11c   :  { %v304_v22 = vrot.slane %v293_v20, 1 }
 0x11e   :  { %v305_v24 = vsel %vm302_vm4, %v303_v21, %v304_v22 }
 0x11f   :  { %v311_v26 = vmax.f32 %v286_v23, %v305_v24 }
 0x120   :  { %v295_v25 = vpop.f32.mrf.mxu1 }
 0x121   :  { %317 = vrot.lane.b32.xlu2 %v311_v26, %s1533_s0  ;;  %v272_v27 = vpop.f32.mrf.mxu0 }
 0x122   :  { %v296_v28 = vadd.f32 %v295_v25, %v272_v27 }
 0x124   :  { %v306_v29 = vrot.slane %v296_v28, 1 }
 0x126   :  { %v313_v31 = vmax.f32 %v291_v18, %v306_v29  ;;  %v307_v32 = vsel %vm302_vm4, %v304_v22, %v306_v29 }
 0x127   :  { %v312_v34 = vmax.f32 %v288_v30, %v307_v32 }
 0x128   :  { %v297_v33 = vpop.f32.mrf.mxu1  ;;  %321 = vrot.lane.b32.xlu1 %v313_v31, %s1533_s0 }
 0x129   :  { %319 = vrot.lane.b32.xlu0 %v312_v34, %s1533_s0  ;;  %v274_v35 = vpop.f32.mrf.mxu0 }
 0x17b   :  { %v318_v37 = vpop.permute.xlu2 %317 }
 0x17c   :  { %v326_v38 = vmax.f32 %v311_v26, %v318_v37 }
 0x17e   :  { %v333_v39 = vadd.f32 %v1499_v36, %v326_v38 }
 0x180   :  { %v336_v40 = vmax.f32 %v333_v39, 0.0 }
 0x182   :  { %345 = vrot.lane.b32.xlu2 %v336_v40, %s1534_s24 }
 0x19a   :  { %v322_v42 = vpop.permute.xlu1 %321 }
 0x19b   :  { %v328_v43 = vmax.f32 %v313_v31, %v322_v42  ;;  %v320_v44 = vpop.permute.xlu0 %319 }
 0x19c   :  { %v327_v45 = vmax.f32 %v312_v34, %v320_v44 }
 0x19d   :  { %v335_v46 = vadd.f32 %v1499_v36, %v328_v43 }
 0x19e   :  { %v334_v47 = vadd.f32 %v1499_v36, %v327_v45 }
 0x19f   :  { %v338_v48 = vmax.f32 %v335_v46, 0.0 }
 0x1a0   :  { %v337_v49 = vmax.f32 %v334_v47, 0.0 }
 0x1a1   :  { %354 = vrot.lane.b32.xlu1 %v338_v48, %s1534_s24 }
 0x1a2   :  { %352 = vrot.lane.b32.xlu0 %v337_v49, %s1534_s24 }
 0x1dc   :  { %v346_v50 = vpop.permute.xlu2 %345 }
 0x1dd   :  { %349 = vst.msk [vmem:[#allocation2 + $0x1] sm:$0xff] %vm348_vm7, %v346_v50 }
 0x213   :  { %v355_v53 = vpop.permute.xlu1 %354 }
 0x214   :  { %361 = vst.msk [vmem:[#allocation2 + $0x12] sm:$0x1] %vm360_vm8, %v355_v53  ;;  %v353_v54 = vpop.permute.xlu0 %352 }
 0x215   :  { %359 = vst.msk [vmem:[#allocation2 + $0xa] sm:$0xfe] %vm358_vm9, %v353_v54 }
 0x21b   :  { %v372_v55 = vld [vmem:[#allocation2 + $0x12] ss:$2 sm:$0x1] }
 0x21c   :  { %v366_v56 = vld [vmem:[#allocation2 + $0x1] ss:$2 sm:$0xff]  ;;  %v370_v58 = vld [vmem:[#allocation2 + $0x2] ss:$2 sm:$0xff] }
 0x21d   :  { %v374_v57 = vld [vmem:[#allocation2 + $0x3] ss:$2 sm:$0xff]  ;;  %379 = vrot.lane.b32.xlu1 %v366_v56, %s1536_s18  ;;  %v364_v17 = vld [vmem:[#allocation2 + $0x10] ss:$2 sm:$0x1] }
 0x21e   :  { %v1484_v59 = vpack.i.bf16 %v372_v55, %v374_v57  ;;  %v368_v60 = vld [vmem:[#allocation2 + $0x11] ss:$2 sm:$0x1]  ;;  %v362_v19 = vld [vmem:[#allocation2] ss:$2 sm:$0xff] }
 0x21f   :  { %v1479_v61 = vpack.i.bf16 %v368_v60, %v370_v58 }
 0x220   :  { %1485 = vrot.lane.b32.xlu0 %v1484_v59, %s1537_s28 }
 0x221   :  { %1480 = vrot.lane.b32.xlu2 %v1479_v61, %s1536_s18  ;;  %v1500_v61 = vld [vmem:[%s1927_s4] ss:$0 sm:$0xff] }
 0x225   :  { %408 = vrot.lane.b32.xlu1 %v376_v62, %s1537_s28 }
 0x228   :  { %400 = vrot.lane.b32.xlu0 %v372_v55, %s1536_s18  ;;  %s1124_s18 = sshll.u32 %s1936_s13, 4  ;;  %s1125_s18 = int_to_ptr.hbm [resolvable:$true] %s1124_s18 }
 0x229   :  { %387 = vrot.lane.b32.xlu2 %v370_v58, %s1537_s28 }
 0x27b   :  { %v1481_v13 = vpop.permute.xlu2 %1480 }
 0x27c   :  { %v1482_v14 = vunpack.i.l.bf16 %v1481_v13  ;;  %v1483_v16 = vunpack.i.h.bf16 %v1481_v13  ;;  %v1428_v13 = vld [vmem:[%s1928_s5 + $0x68] sm:$0xff] }
 0x27d   :  { %849 = vmatpush.bf16.msrb.mxu3 %v1428_v13 }
 0x27e   :  { %v412_v15 = vsel %vm339_vm5, %v366_v56, %v1482_v14  ;;  %v394_v20 = vsel %vm339_vm5, %v364_v17, %v1483_v16 }
 0x27f   :  { %v420_v7 = vrot.slane %v412_v15, 7  ;;  %v1427_v15 = vld [vmem:[%s1928_s5 + $0x60] sm:$0xff] }
 0x281   :  { %v430_v22 = vsel %vm131_vm0, %v394_v20, %v420_v7  ;;  %850 = vmatpush.bf16.msrb.mxu3 %v1427_v15 }
 0x283   :  { %v388_v29 = vpop.permute.xlu2 %387 }
 0x28f   :  { %v380_v18 = vpop.permute.xlu1 %379 }
 0x290   :  { %v393_v21 = vsel %vm339_vm5, %v362_v19, %v380_v18  ;;  %v396_v31 = vsel %vm395_vm10, %v380_v18, %v388_v29  ;;  %v1417_v18 = vld [vmem:[%s1928_s5 + $0x10] sm:$0xff]  ;;  %v1415_v29 = vld [vmem:[%s1928_s5] sm:$0xff] }
 0x291   :  { %v432_v24 = vpack.c.bf16 %v430_v22, %v393_v21  ;;  %v1425_v19 = vld [vmem:[%s1928_s5 + $0x50] sm:$0xff] }
 0x292   :  { %v1486_v23 = vpop.permute.xlu0 %1485 }
 0x293   :  { %v1488_v25 = vunpack.i.h.bf16 %v1486_v23  ;;  %v1487_v26 = vunpack.i.l.bf16 %v1486_v23  ;;  %571 = vmatmul.bf16.vlgmr.msra.gmra.mxu2 %v432_v24 }
 0x295   :  { %v414_v27 = vsel %vm395_vm10, %v1482_v14, %v1487_v26  ;;  %v397_v30 = vsel %vm395_vm10, %v1483_v16, %v1488_v25  ;;  %v1419_v14 = vld [vmem:[%s1928_s5 + $0x20] sm:$0xff]  ;;  %v1418_v16 = vld [vmem:[%s1928_s5 + $0x18] sm:$0xff]  ;;  %v1424_v26 = vld [vmem:[%s1928_s5 + $0x48] sm:$0xff] }
 0x296   :  { %v421_v28 = vrot.slane %v414_v27, 7  ;;  %836 = vmatpush.bf16.msrb.mxu1 %v1419_v14  ;;  %v1416_v27 = vld [vmem:[%s1928_s5 + $0x8] sm:$0xff] }
 0x297   :  { %v409_v37 = vpop.permute.xlu1 %408 }
 0x298   :  { %v431_v32 = vsel %vm131_vm0, %v397_v30, %v421_v28 }
 0x299   :  { %v433_v33 = vpack.c.bf16 %v431_v32, %v396_v31 }
 0x29a   :  { %v401_v34 = vpop.permute.xlu0 %400  ;;  %837 = vmatpush.bf16.msrb.mxu1 %v1418_v16 }
 0x29b   :  { %v413_v35 = vsel %vm339_vm5, %v368_v60, %v401_v34  ;;  %1247 = vmatmul.msk.bf16.vlgmr.msra.gmra.mxu3 %vm556_vm11, %v433_v33  ;;  %v415_v38 = vsel %vm395_vm10, %v401_v34, %v409_v37 }
 0x29c   :  { %v422_v36 = vrot.slane %v413_v35, 7  ;;  %v424_v40 = vrot.slane %v415_v38, 7 }
 0x29e   :  { %v423_v39 = vsel %vm131_vm0, %v420_v7, %v422_v36  ;;  %v425_v43 = vsel %vm131_vm0, %v421_v28, %v424_v40  ;;  %v1426_v7 = vld [vmem:[%s1928_s5 + $0x58] sm:$0xff]  ;;  %838 = vmatpush.bf16.msrb.mxu1 %v1417_v18  ;;  %v1423_v28 = vld [vmem:[%s1928_s5 + $0x40] sm:$0xff] }
 0x29f   :  { %v434_v42 = vpack.c.bf16 %v423_v39, %v423_v39  ;;  %v435_v44 = vpack.c.bf16 %v425_v43, %v425_v43  ;;  %851 = vmatpush.bf16.msrb.mxu3 %v1426_v7 }
 0x2a2   :  { %839 = vmatpush.bf16.msrb.mxu1 %v1416_v27 }
 0x2a3   :  { %576 = vmatmul.bf16.gmra.mxu2 %v434_v42  ;;  %852 = vmatpush.bf16.msrb.mxu3 %v1425_v19 }
 0x2a6   :  { %840 = vmatpush.bf16.msrb.mxu1 %v1415_v29 }
 0x2a7   :  { %853 = vmatpush.bf16.msrb.mxu3 %v1424_v26  ;;  %v1446_v26 = vld [vmem:[%s1934_s11 + $0x8] sm:$0xff] }
 0x2ab   :  { %1248 = vmatmul.msk.bf16.gmra.mxu3 %vm556_vm11, %v435_v44 }
 0x2ac   :  { %854 = vmatpush.bf16.msrb.mxu3 %v1423_v28  ;;  %v1502_v28 = vld [vmem:[%s1931_s8] ss:$0 sm:$0xff] }
 0x316   :  { %v572_v45 = vpop.f32.mrf.mxu2 }
 0x31e   :  { %v590_v46 = vpop.f32.mrf.mxu3  ;;  %v574_v47 = vpop.f32.mrf.mxu2 }
 0x31f   :  { %v591_v56 = vadd.f32 %v590_v46, %v572_v45 }
 0x326   :  { %v592_v48 = vpop.f32.mrf.mxu3  ;;  %v577_v49 = vpop.f32.mrf.mxu2 }
 0x327   :  { %v593_v50 = vadd.f32 %v592_v48, %v574_v47 }
 0x329   :  { %v601_v54 = vrot.slane %v593_v50, 1 }
 0x32e   :  { %v595_v51 = vpop.f32.mrf.mxu3  ;;  %v579_v53 = vpop.f32.mrf.mxu2 }
 0x32f   :  { %v596_v52 = vadd.f32 %v595_v51, %v577_v49  ;;  %v1440_v51 = vld [vmem:[%s1930_s7 + $0x38] sm:$0xff]  ;;  %v1439_v53 = vld [vmem:[%s1930_s7 + $0x30] sm:$0xff] }
 0x330   :  { %997 = vmatpush.bf16.msra.mxu3 %v1440_v51 }
 0x331   :  { %v602_v55 = vrot.slane %v596_v52, 1  ;;  %v1436_v52 = vld [vmem:[%s1930_s7 + $0x18] sm:$0xff] }
 0x332   :  { %939 = vmatpush.bf16.msra.mxu1 %v1436_v52 }
 0x333   :  { %v607_v57 = vmax.f32 %v593_v50, %v602_v55  ;;  %v603_v58 = vsel %vm302_vm4, %v601_v54, %v602_v55  ;;  %vm877_vm4 = vcmask 1042432  }
 0x334   :  { %v606_v59 = vmax.f32 %v591_v56, %v603_v58  ;;  %998 = vmatpush.bf16.msra.mxu3 %v1439_v53 }
 0x335   :  { %612 = vrot.lane.b32.xlu0 %v607_v57, %s1533_s0 }
 0x336   :  { %v597_v60 = vpop.f32.mrf.mxu3  ;;  %610 = vrot.lane.b32.xlu2 %v606_v59, %s1533_s0 }
 0x390   :  { %v611_v62 = vpop.permute.xlu2 %610 }
 0x391   :  { %v616_v63 = vmax.f32 %v606_v59, %v611_v62 }
 0x393   :  { %v622_v0 = vadd.f32 %v1500_v61, %v616_v63 }
 0x395   :  { %v624_v1 = vmax.f32 %v622_v0, 0.0 }
 0x397   :  { %631 = vrot.lane.b32.xlu1 %v624_v1, %s1538_s1 }
 0x3a7   :  { %v613_v2 = vpop.permute.xlu0 %612 }
 0x3a8   :  { %v617_v3 = vmax.f32 %v607_v57, %v613_v2 }
 0x3aa   :  { %v623_v4 = vadd.f32 %v1500_v61, %v617_v3 }
 0x3ac   :  { %v625_v5 = vmax.f32 %v623_v4, 0.0  ;;  %v1435_v4 = vld [vmem:[%s1930_s7 + $0x10] sm:$0xff] }
 0x3ad   :  { %940 = vmatpush.bf16.msra.mxu1 %v1435_v4 }
 0x3ae   :  { %637 = vrot.lane.b32.xlu2 %v625_v5, %s1538_s1  ;;  %v1438_v5 = vld [vmem:[%s1930_s7 + $0x28] sm:$0xff] }
 0x3af   :  { %999 = vmatpush.bf16.msra.mxu3 %v1438_v5 }
 0x3b1   :  { %941 = vmatpush.bf16.msra.mxu1 %v1434_v6 }
 0x3b3   :  { %1000 = vmatpush.bf16.msra.mxu3 %v1437_v8 }
 0x3b5   :  { %942 = vmatpush.bf16.msra.mxu1 %v1433_v9 }
 0x408   :  { %v638_v17 = vpop.permute.xlu2 %637 }
 0x409   :  { %643 = vst.msk [vmem:[#allocation3 + $0xa] sm:$0x1] %vm642_vm14, %v638_v17  ;;  %v632_v20 = vpop.permute.xlu1 %631 }
 0x40a   :  { %635 = vst.msk [vmem:[#allocation3 + $0x1] sm:$0xf] %vm634_vm15, %v632_v20 }
 0x40b   :  { %641 = vst.msk [vmem:[#allocation3 + $0x2] sm:$0xe0] %vm640_vm1, %v632_v20 }
 0x412   :  { %v648_v21 = vld [vmem:[#allocation3 + $0x2] ss:$2 sm:$0x1f]  ;;  %v650_v22 = vld [vmem:[#allocation3 + $0x3] ss:$2 sm:$0x1f] }
 0x413   :  { %v1494_v23 = vpack.i.bf16 %v648_v21, %v650_v22  ;;  %v646_v24 = vld [vmem:[#allocation3 + $0x1] ss:$2 sm:$0x1f]  ;;  %v644_v40 = vld [vmem:[#allocation3] ss:$2 sm:$0x1f] }
 0x414   :  { %v1489_v25 = vpack.i.bf16 %v646_v24, %v648_v21 }
 0x415   :  { %1495 = vrot.lane.b32.xlu1 %v1494_v23, %s1533_s0  ;;  %v1441_v23 = vld [vmem:[%s1932_s9] sm:$0xff] }
 0x416   :  { %1490 = vrot.lane.b32.xlu0 %v1489_v25, %s1539_s26  ;;  %1055 = vmatpush.bf16.msrb.mxu0 %v1441_v23  ;;  %v1447_v25 = vld [vmem:[%s1934_s11 + $0x10] sm:$0xff]  ;;  %s1540_s26 = smov [#allocation4]  }
 0x487   :  { %v1496_v30 = vpop.permute.xlu1 %1495 }
 0x488   :  { %v1497_v31 = vunpack.i.l.bf16 %v1496_v30  ;;  %v1491_v32 = vpop.permute.xlu0 %1490  ;;  %v1498_v33 = vunpack.i.h.bf16 %v1496_v30 }
 0x489   :  { %v1493_v34 = vunpack.i.h.bf16 %v1491_v32  ;;  %v1492_v35 = vunpack.i.l.bf16 %v1491_v32 }
 0x48a   :  { %v675_v36 = vrot.slane %v1497_v31, 3 }
 0x48b   :  { %v669_v37 = vsel %vm626_vm13, %v646_v24, %v1492_v35  ;;  %v670_v38 = vsel %vm660_vm2, %v1492_v35, %v1497_v31  ;;  %v659_v45 = vsel %vm626_vm13, %v644_v40, %v1493_v34  ;;  %v661_v46 = vsel %vm660_vm2, %v1493_v34, %v1498_v33  ;;  %v1448_v24 = vld [vmem:[%s1934_s11 + $0x18] sm:$0xff] }
 0x48c   :  { %v682_v39 = vsel %vm679_vm3, %v1498_v33, %v675_v36  ;;  %v673_v42 = vrot.slane %v669_v37, 3  ;;  %v674_v43 = vrot.slane %v670_v38, 3  ;;  %1106 = vmatpush.bf16.msra.mxu2 %v1448_v24  ;;  %v1503_v37 = vld [vmem:[%s1933_s10] ss:$0 sm:$0xff] }
 0x48d   :  { %v685_v44 = vpack.c.bf16 %v675_v36, %v682_v39  ;;  %v1445_v36 = vld [vmem:[%s1934_s11] sm:$0xff] }
 0x48e   :  { %v680_v47 = vsel %vm679_vm3, %v659_v45, %v673_v42  ;;  %v681_v48 = vsel %vm679_vm3, %v661_v46, %v674_v43 }
 0x48f   :  { %1321 = vmatmul.msk.bf16.vlgmr.msrb.gmra.mxu2 %vm395_vm10, %v685_v44  ;;  %v683_v49 = vpack.c.bf16 %v673_v42, %v680_v47  ;;  %v684_v50 = vpack.c.bf16 %v674_v43, %v681_v48  ;;  %v1504_v44 = vld [vmem:[%s1935_s12] ss:$0 sm:$0xff] }
 0x490   :  { %1107 = vmatpush.bf16.msra.mxu2 %v1447_v25 }
 0x491   :  { %841 = vmatmul.bf16.vlgmr.msrb.gmra.mxu1 %v683_v49  ;;  %855 = vmatmul.bf16.vlgmr.msrb.gmra.mxu3 %v684_v50 }
 0x494   :  { %1108 = vmatpush.bf16.msra.mxu2 %v1446_v26 }
 0x498   :  { %1109 = vmatpush.bf16.msra.mxu2 %v1445_v36 }
 0x50e   :  { %v842_v54 = vpop.f32.mrf.mxu1 }
 0x512   :  { %v870_v55 = vpop.f32.mrf.mxu2 }
 0x514   :  { %v856_v56 = vpop.f32.mrf.mxu3 }
 0x515   :  { %v857_v57 = vadd.f32 %v856_v56, %v842_v54 }
 0x516   :  { %v844_v58 = vpop.f32.mrf.mxu1 }
 0x517   :  { %v871_v60 = vadd.f32 %v870_v55, %v857_v57 }
 0x519   :  { %v878_v0 = vrot.slane %v871_v60, 5 }
 0x51a   :  { %v872_v62 = vpop.f32.mrf.mxu2 }
 0x51c   :  { %v858_v59 = vpop.f32.mrf.mxu3 }
 0x51d   :  { %v859_v61 = vadd.f32 %v858_v59, %v844_v58 }
 0x51f   :  { %v873_v63 = vadd.f32 %v872_v62, %v859_v61 }
 0x521   :  { %v879_v1 = vrot.slane %v873_v63, 5 }
 0x523   :  { %v880_v2 = vsel %vm877_vm4, %v878_v0, %v879_v1 }
 0x524   :  { %v882_v3 = vmax.f32 %v871_v60, %v880_v2 }
 0x526   :  { %884 = vrot.lane.b32.xlu2 %v882_v3, %s1533_s0  ;;  %s1122_s0 = sshll.u32 %s1540_s26, 4  ;;  %s1123_s0 = int_to_ptr.vmem [resolvable:$true] %s1122_s0 }
 0x580   :  { %v885_v13 = vpop.permute.xlu2 %884 }
 0x581   :  { %v887_v14 = vmax.f32 %v882_v3, %v885_v13 }
 0x583   :  { %v892_v15 = vadd.f32 %v1501_v12, %v887_v14 }
 0x585   :  { %v893_v16 = vmax.f32 %v892_v15, 0.0 }
 0x587   :  { %v896_v7 = vrot.slane %v893_v16, 2  ;;  %v952_v17 = vrot.slane %v893_v16, 1  ;;  %v954_v18 = vrot.slane %v893_v16, 3 }
 0x589   :  { %v898_v19 = vsel %vm131_vm0, %v893_v16, %v896_v7  ;;  %v956_v20 = vsel %vm131_vm0, %v952_v17, %v954_v18  ;;  %vm1115_vm0 = vcmask 74752  }
 0x58a   :  { %v899_v21 = vpack.c.bf16 %v898_v19, %v898_v19  ;;  %v957_v22 = vpack.c.bf16 %v956_v20, %v956_v20 }
 0x58c   :  { %1338 = vmatmul.msk.bf16.vlgmr.msra.gmra.mxu1 %vm660_vm2, %v899_v21  ;;  %1355 = vmatmul.msk.bf16.vlgmr.msra.gmra.mxu3 %vm660_vm2, %v957_v22 }
 0x609   :  { %v944_v27 = vpop.f32.mrf.mxu1 }
 0x60a   :  { %v951_v29 = vadd.f32 %v1502_v28, %v944_v27 }
 0x60f   :  { %v1002_v30 = vpop.f32.mrf.mxu3 }
 0x610   :  { %v1006_v31 = vadd.f32 %v1002_v30, %v951_v29 }
 0x611   :  { %v946_v32 = vpop.f32.mrf.mxu1 }
 0x612   :  { %v1007_v33 = vmax.f32 %v1006_v31, 0.0 }
 0x614   :  { %v1008_v34 = vpack.c.bf16 %v1007_v33, %v1007_v33 }
 0x616   :  { %1372 = vmatmul.msk.bf16.vlgmr.msrb.gmra.mxu0 %vm660_vm2, %v1008_v34 }
 0x617   :  { %v1004_v35 = vpop.f32.mrf.mxu3 }
 0x693   :  { %v1057_v38 = vpop.f32.mrf.mxu0 }
 0x694   :  { %v1058_v39 = vadd.f32 %v1503_v37, %v1057_v38 }
 0x696   :  { %v1061_v40 = vmax.f32 %v1058_v39, 0.0 }
 0x698   :  { %v1062_v42 = vpack.c.bf16 %v1061_v40, %v1061_v40 }
 0x69a   :  { %1389 = vmatmul.msk.bf16.vlgmr.msra.gmra.mxu2 %vm660_vm2, %v1062_v42 }
 0x69b   :  { %v1059_v43 = vpop.f32.mrf.mxu0 }
 0x71d   :  { %v1111_v45 = vpop.f32.mrf.mxu2 }
 0x71e   :  { %v1112_v46 = vadd.f32 %v1504_v44, %v1111_v45 }
 0x720   :  { %1116 = vst.msk [vmem:[#allocation4] sm:$0x3] %vm1115_vm0, %v1112_v46 }
 0x721   :  { %1127 = dma.vmem_to_hbm [thread:$0]  %s1123_s0, 32, %s1125_s18, [#allocation5]  }
 0x725   :  { %v1113_v47 = vpop.f32.mrf.mxu2 }
 0x726   :  { %1529 = dma.done.wait [#allocation5], 32  }
 0x727   :  { %1530 = vsyncadd [#allocation5], 4294967264 }
 0x728   :  { %1132 = vsyncpa [#allocation5], 1 }

</bundles_post_ra>
